<compile_context>
chip_gen: v7x
topology: tpu7x:2x2x1
jax: 0.10.0
libtpu: 0.0.40
codegen_flags: <defaults>
</compile_context>

<pallas_src>
import functools

import jax
import jax.numpy as jnp
from jax.experimental import pallas as pl
from jax.experimental.pallas import tpu as pltpu


MAX_T_TILE = 512        # cap on time values per grid step (sublane multiple)
GATE_ONE_BIAS = 30.0    # sigmoid(30) == 1.0 exactly in float32


def _round_up(x, m):
    return ((x + m - 1) // m) * m


def _hypernet_kernel(t_ref, w1_ref, b1_ref, w2_ref, b2_ref, w3c_ref, b3c_ref,
                     out_ref, *, out_pad):
    # fc1: (Tt, 1) broadcast against (1, H) -> (Tt, H); pure VPU, no MXU.
    h1 = jnp.tanh(t_ref[...] * w1_ref[...] + b1_ref[...])

    # fc2: (Tt, H) @ (H, H) + b, tanh.
    h2 = jnp.tanh(
        jnp.dot(h1, w2_ref[...], preferred_element_type=jnp.float32)
        + b2_ref[...]
    )

    # fc3 (packed): one matmul -> (Tt, 2*out_pad).  Splitting at out_pad is a
    # whole-vreg (128-lane) boundary slice -> free.
    p = (jnp.dot(h2, w3c_ref[...], preferred_element_type=jnp.float32)
         + b3c_ref[...])
    main = p[:, :out_pad]          # [ W | U | B | 0 ]
    gate_logits = p[:, out_pad:]   # G in the U lanes, +30 elsewhere (gate==1)

    # Exact sigmoid: EUP exp + true divide (gate==1.0 exactly where bias=30).
    gate = 1.0 / (1.0 + jnp.exp(-gate_logits))

    out_ref[...] = main * gate     # one dense (Tt, out_pad) store


def pack_fc3(w3, b3, in_out_dim, width):
    """Pack the torch-style fused fc3 (H, 3*bs+width) into the kernel layout.

    Returns w3c (H, 2*out_pad), b3c (1, 2*out_pad), out_pad, where
      main cols  [0:bs]=W, [bs:2bs]=U, [2bs:2bs+width]=B, rest zero
      gate cols  [bs:2bs]=G (aligned with U), rest zero weight / bias=30
    """
    H = w3.shape[0]
    bs = width * in_out_dim
    fused_dim = 2 * bs + width
    out_pad = _round_up(fused_dim, 128)

    w_main = jnp.zeros((H, out_pad), jnp.float32)
    w_main = w_main.at[:, :bs].set(w3[:, :bs])                        # W
    w_main = w_main.at[:, bs:2 * bs].set(w3[:, bs:2 * bs])            # U
    w_main = w_main.at[:, 2 * bs:2 * bs + width].set(
        w3[:, 3 * bs:3 * bs + width])                                 # B
    b_main = jnp.zeros((1, out_pad), jnp.float32)
    b_main = b_main.at[:, :bs].set(b3[:, :bs])
    b_main = b_main.at[:, bs:2 * bs].set(b3[:, bs:2 * bs])
    b_main = b_main.at[:, 2 * bs:2 * bs + width].set(
        b3[:, 3 * bs:3 * bs + width])

    w_gate = jnp.zeros((H, out_pad), jnp.float32)
    w_gate = w_gate.at[:, bs:2 * bs].set(w3[:, 2 * bs:3 * bs])        # G -> U lanes
    b_gate = jnp.full((1, out_pad), GATE_ONE_BIAS, jnp.float32)       # sigmoid->1
    b_gate = b_gate.at[:, bs:2 * bs].set(b3[:, 2 * bs:3 * bs])

    w3c = jnp.concatenate([w_main, w_gate], axis=1)   # (H, 2*out_pad)
    b3c = jnp.concatenate([b_main, b_gate], axis=1)   # (1, 2*out_pad)
    return w3c, b3c, out_pad


def hypernetwork_forward_batched(ts, params, in_out_dim, hidden_dim, width):
    """Batched forward over a vector of time values.

    Returns [W, B, U] with shapes (T, width, in_out_dim, 1), (T, width, 1, 1),
    (T, width, 1, in_out_dim).
    """
    bs = width * in_out_dim
    fused_dim = 2 * bs + width
    out_pad = _round_up(fused_dim, 128)
    H = hidden_dim

    ts = jnp.asarray(ts, jnp.float32).reshape(-1)
    T = ts.shape[0]
    # Adaptive tile: one grid step for small T, big tiles for large T.
    t_tile = min(MAX_T_TILE, _round_up(max(T, 1), 8))
    T_padded = _round_up(max(T, 1), t_tile)
    t2 = jnp.zeros((T_padded, 1), jnp.float32).at[:T, 0].set(ts)

    kernel = functools.partial(_hypernet_kernel, out_pad=out_pad)

    const = lambda i: (0, 0)  # weights resident in VMEM across grid steps

    fused = pl.pallas_call(
        kernel,
        out_shape=jax.ShapeDtypeStruct((T_padded, out_pad), jnp.float32),
        grid=(T_padded // t_tile,),
        in_specs=[
            pl.BlockSpec((t_tile, 1), lambda i: (i, 0)),     # t
            pl.BlockSpec((1, H), const),                     # w1 (1, H)
            pl.BlockSpec((1, H), const),                     # b1
            pl.BlockSpec((H, H), const),                     # w2
            pl.BlockSpec((1, H), const),                     # b2
            pl.BlockSpec((H, 2 * out_pad), const),           # w3 packed
            pl.BlockSpec((1, 2 * out_pad), const),           # b3 packed
        ],
        out_specs=pl.BlockSpec((t_tile, out_pad), lambda i: (i, 0)),
        compiler_params=pltpu.CompilerParams(
            dimension_semantics=("parallel",)),
    )(
        t2,
        params["w1"], params["b1"],
        params["w2"], params["b2"],
        params["w3c"], params["b3c"],
    )

    fused = fused[:T]
    W = fused[:, :bs].reshape(T, width, in_out_dim, 1)
    U = fused[:, bs:2 * bs].reshape(T, width, 1, in_out_dim)
    B = fused[:, 2 * bs:2 * bs + width].reshape(T, width, 1, 1)
    return [W, B, U]


def hypernetwork_forward(t, params, in_out_dim, hidden_dim, width):
    """Scalar-t forward with the exact PyTorch module semantics/shapes."""
    W, B, U = hypernetwork_forward_batched(
        jnp.reshape(jnp.asarray(t, jnp.float32), (1,)),
        params, in_out_dim, hidden_dim, width)
    return [W[0], B[0], U[0]]


def init_params(key, in_out_dim, hidden_dim, width):
    """Deterministic synthetic parameters (torch-Linear-style uniform init),
    stored transposed (fan_in, fan_out); fc3 is packed for the kernel."""
    blocksize = width * in_out_dim
    out_dim = 3 * blocksize + width

    def linear(key, fan_in, fan_out):
        kw, kb = jax.random.split(key)
        bound = 1.0 / jnp.sqrt(jnp.float32(fan_in))
        w = jax.random.uniform(kw, (fan_in, fan_out), jnp.float32, -bound, bound)
        b = jax.random.uniform(kb, (1, fan_out), jnp.float32, -bound, bound)
        return w, b

    k1, k2, k3 = jax.random.split(key, 3)
    w1, b1 = linear(k1, 1, hidden_dim)
    w2, b2 = linear(k2, hidden_dim, hidden_dim)
    w3, b3 = linear(k3, hidden_dim, out_dim)

    w3c, b3c, _ = pack_fc3(w3, b3, in_out_dim, width)
    params = {"w1": w1, "b1": b1, "w2": w2, "b2": b2, "w3c": w3c, "b3c": b3c}
    return params, (w1, b1, w2, b2, w3, b3)


def reference_forward(t, raw, in_out_dim, hidden_dim, width):
    """Pure-JAX reference matching the PyTorch module exactly (scalar t)."""
    w1, b1, w2, b2, w3, b3 = raw
    blocksize = width * in_out_dim
    p = jnp.asarray(t, jnp.float32).reshape(1, 1)
    p = jnp.tanh(p @ w1 + b1)
    p = jnp.tanh(p @ w2 + b2)
    p = (p @ w3 + b3).reshape(-1)
    W = p[:blocksize].reshape(width, in_out_dim, 1)
    U = p[blocksize:2 * blocksize].reshape(width, 1, in_out_dim)
    G = p[2 * blocksize:3 * blocksize].reshape(width, 1, in_out_dim)
    U = U * jax.nn.sigmoid(G)
    B = p[3 * blocksize:].reshape(width, 1, 1)
    return [W, B, U]


if __name__ == "__main__":
    in_out_dim, hidden_dim, width = 2, 32, 8

    key = jax.random.PRNGKey(0)
    k_params, k_t = jax.random.split(key)
    params, raw = init_params(k_params, in_out_dim, hidden_dim, width)

    # --- scalar-t path (module semantics) ---
    t = jax.random.uniform(k_t, (), jnp.float32)
    W, B, U = hypernetwork_forward(t, params, in_out_dim, hidden_dim, width)
    jax.block_until_ready((W, B, U))

    W_ref, B_ref, U_ref = reference_forward(t, raw, in_out_dim, hidden_dim, width)
    assert W.shape == (width, in_out_dim, 1)
    assert B.shape == (width, 1, 1)
    assert U.shape == (width, 1, in_out_dim)
    assert jnp.allclose(W, W_ref, atol=1e-5)
    assert jnp.allclose(B, B_ref, atol=1e-5)
    assert jnp.allclose(U, U_ref, atol=2e-5)

    # --- batched-t path (amortizes launch/DMA overhead; T not a multiple of 8
    #     to exercise the padding path) ---
    T = 13
    ts = jax.random.uniform(jax.random.PRNGKey(1), (T,), jnp.float32)
    Wb, Bb, Ub = hypernetwork_forward_batched(
        ts, params, in_out_dim, hidden_dim, width)
    jax.block_until_ready((Wb, Bb, Ub))

    assert Wb.shape == (T, width, in_out_dim, 1)
    assert Bb.shape == (T, width, 1, 1)
    assert Ub.shape == (T, width, 1, in_out_dim)
    for i in range(T):
        Wr, Br, Ur = reference_forward(ts[i], raw, in_out_dim, hidden_dim, width)
        assert jnp.allclose(Wb[i], Wr, atol=1e-5)
        assert jnp.allclose(Bb[i], Br, atol=1e-5)
        assert jnp.allclose(Ub[i], Ur, atol=2e-5)

    print("KERNEL_OK")
</pallas_src>

<mosaic_0001>
module attributes {stable_mosaic.version = 11 : i64} {
  func.func @_hypernet_kernel(%arg0: i32, %arg1: memref<8x1xf32, #tpu.memory_space<vmem>>, %arg2: memref<1x32xf32, #tpu.memory_space<vmem>>, %arg3: memref<1x32xf32, #tpu.memory_space<vmem>>, %arg4: memref<32x32xf32, #tpu.memory_space<vmem>>, %arg5: memref<1x32xf32, #tpu.memory_space<vmem>>, %arg6: memref<32x256xf32, #tpu.memory_space<vmem>>, %arg7: memref<1x256xf32, #tpu.memory_space<vmem>>, %arg8: memref<8x128xf32, #tpu.memory_space<vmem>>) attributes {dimension_semantics = [#tpu.dimension_semantics<parallel>], iteration_bounds = array<i64: 1>, scalar_prefetch = 0 : i64, scratch_operands = 0 : i64, tpu.core_type = #tpu.core_type<tc>, window_params = [{transform_indices = @transform_0, window_bounds = array<i64: 8, 1>}, {pipeline_mode = #tpu.pipeline_mode<synchronous>, transform_indices = @transform_1, window_bounds = array<i64: 1, 32>}, {pipeline_mode = #tpu.pipeline_mode<synchronous>, transform_indices = @transform_2, window_bounds = array<i64: 1, 32>}, {pipeline_mode = #tpu.pipeline_mode<synchronous>, transform_indices = @transform_3, window_bounds = array<i64: 32, 32>}, {pipeline_mode = #tpu.pipeline_mode<synchronous>, transform_indices = @transform_4, window_bounds = array<i64: 1, 32>}, {pipeline_mode = #tpu.pipeline_mode<synchronous>, transform_indices = @transform_5, window_bounds = array<i64: 32, 256>}, {pipeline_mode = #tpu.pipeline_mode<synchronous>, transform_indices = @transform_6, window_bounds = array<i64: 1, 256>}, {transform_indices = @transform_7, window_bounds = array<i64: 8, 128>}]} {
    %c0 = arith.constant 0 : index
    %c0_0 = arith.constant 0 : index
    %0 = vector.load %arg1[%c0, %c0_0] : memref<8x1xf32, #tpu.memory_space<vmem>>, vector<8x1xf32>
    %c0_1 = arith.constant 0 : index
    %c0_2 = arith.constant 0 : index
    %1 = vector.load %arg2[%c0_1, %c0_2] : memref<1x32xf32, #tpu.memory_space<vmem>>, vector<1x32xf32>
    %2 = vector.broadcast %0 : vector<8x1xf32> to vector<8x32xf32>
    %3 = vector.broadcast %1 : vector<1x32xf32> to vector<8x32xf32>
    %4 = arith.mulf %2, %3 : vector<8x32xf32>
    %c0_3 = arith.constant 0 : index
    %c0_4 = arith.constant 0 : index
    %5 = vector.load %arg3[%c0_3, %c0_4] : memref<1x32xf32, #tpu.memory_space<vmem>>, vector<1x32xf32>
    %6 = vector.broadcast %5 : vector<1x32xf32> to vector<8x32xf32>
    %7 = arith.addf %4, %6 : vector<8x32xf32>
    %8 = math.tanh %7 : vector<8x32xf32>
    %c0_5 = arith.constant 0 : index
    %c0_6 = arith.constant 0 : index
    %9 = vector.load %arg4[%c0_5, %c0_6] : memref<32x32xf32, #tpu.memory_space<vmem>>, vector<32x32xf32>
    %cst = arith.constant dense<0.000000e+00> : vector<8x32xf32>
    %10 = tpu.matmul %8, %9, %cst {dimension_numbers = #tpu.dot_dimension_numbers<[1], [0], [0], [1], [0, 0, 1, 1], [], []>} : vector<8x32xf32>, vector<32x32xf32>, vector<8x32xf32> -> vector<8x32xf32>
    %c0_7 = arith.constant 0 : index
    %c0_8 = arith.constant 0 : index
    %11 = vector.load %arg5[%c0_7, %c0_8] : memref<1x32xf32, #tpu.memory_space<vmem>>, vector<1x32xf32>
    %12 = vector.broadcast %11 : vector<1x32xf32> to vector<8x32xf32>
    %13 = arith.addf %10, %12 : vector<8x32xf32>
    %14 = math.tanh %13 : vector<8x32xf32>
    %c0_9 = arith.constant 0 : index
    %c0_10 = arith.constant 0 : index
    %15 = vector.load %arg6[%c0_9, %c0_10] : memref<32x256xf32, #tpu.memory_space<vmem>>, vector<32x256xf32>
    %cst_11 = arith.constant dense<0.000000e+00> : vector<8x256xf32>
    %16 = tpu.matmul %14, %15, %cst_11 {dimension_numbers = #tpu.dot_dimension_numbers<[1], [0], [0], [1], [0, 0, 1, 1], [], []>} : vector<8x32xf32>, vector<32x256xf32>, vector<8x256xf32> -> vector<8x256xf32>
    %c0_12 = arith.constant 0 : index
    %c0_13 = arith.constant 0 : index
    %17 = vector.load %arg7[%c0_12, %c0_13] : memref<1x256xf32, #tpu.memory_space<vmem>>, vector<1x256xf32>
    %18 = vector.broadcast %17 : vector<1x256xf32> to vector<8x256xf32>
    %19 = arith.addf %16, %18 : vector<8x256xf32>
    %20 = vector.extract_strided_slice %19 {offsets = [0, 0], sizes = [8, 128], strides = [1, 1]} : vector<8x256xf32> to vector<8x128xf32>
    %21 = vector.extract_strided_slice %19 {offsets = [0, 128], sizes = [8, 128], strides = [1, 1]} : vector<8x256xf32> to vector<8x128xf32>
    %cst_14 = arith.constant 0.000000e+00 : f32
    %22 = vector.broadcast %cst_14 : f32 to vector<8x128xf32>
    %23 = arith.subf %22, %21 : vector<8x128xf32>
    %24 = math.exp %23 : vector<8x128xf32>
    %cst_15 = arith.constant 1.000000e+00 : f32
    %25 = vector.broadcast %cst_15 : f32 to vector<8x128xf32>
    %26 = arith.addf %25, %24 : vector<8x128xf32>
    %cst_16 = arith.constant 1.000000e+00 : f32
    %27 = vector.broadcast %cst_16 : f32 to vector<8x128xf32>
    %28 = arith.divf %27, %26 : vector<8x128xf32>
    %29 = arith.mulf %20, %28 : vector<8x128xf32>
    %c0_17 = arith.constant 0 : index
    %c0_18 = arith.constant 0 : index
    %30 = vector.load %arg8[%c0_17, %c0_18] : memref<8x128xf32, #tpu.memory_space<vmem>>, vector<8x128xf32>
    tpu.vector_store %arg8[%c0_17, %c0_18], %29 {strides = array<i32>} : memref<8x128xf32, #tpu.memory_space<vmem>>, vector<8x128xf32>,
    return
  }
  func.func @transform_0(%arg0: i32) -> (i32, i32) {
    %c0_i32 = arith.constant 0 : i32
    %c0_i32_0 = arith.constant 0 : i32
    return %arg0, %c0_i32 : i32, i32
  }
  func.func @transform_1(%arg0: i32) -> (i32, i32) {
    %c0_i32 = arith.constant 0 : i32
    %c0_i32_0 = arith.constant 0 : i32
    %c0_i32_1 = arith.constant 0 : i32
    return %c0_i32, %c0_i32_0 : i32, i32
  }
  func.func @transform_2(%arg0: i32) -> (i32, i32) {
    %c0_i32 = arith.constant 0 : i32
    %c0_i32_0 = arith.constant 0 : i32
    %c0_i32_1 = arith.constant 0 : i32
    return %c0_i32, %c0_i32_0 : i32, i32
  }
  func.func @transform_3(%arg0: i32) -> (i32, i32) {
    %c0_i32 = arith.constant 0 : i32
    %c0_i32_0 = arith.constant 0 : i32
    %c0_i32_1 = arith.constant 0 : i32
    return %c0_i32, %c0_i32_0 : i32, i32
  }
  func.func @transform_4(%arg0: i32) -> (i32, i32) {
    %c0_i32 = arith.constant 0 : i32
    %c0_i32_0 = arith.constant 0 : i32
    %c0_i32_1 = arith.constant 0 : i32
    return %c0_i32, %c0_i32_0 : i32, i32
  }
  func.func @transform_5(%arg0: i32) -> (i32, i32) {
    %c0_i32 = arith.constant 0 : i32
    %c0_i32_0 = arith.constant 0 : i32
    %c0_i32_1 = arith.constant 0 : i32
    return %c0_i32, %c0_i32_0 : i32, i32
  }
  func.func @transform_6(%arg0: i32) -> (i32, i32) {
    %c0_i32 = arith.constant 0 : i32
    %c0_i32_0 = arith.constant 0 : i32
    %c0_i32_1 = arith.constant 0 : i32
    return %c0_i32, %c0_i32_0 : i32, i32
  }
  func.func @transform_7(%arg0: i32) -> (i32, i32) {
    %c0_i32 = arith.constant 0 : i32
    %c0_i32_0 = arith.constant 0 : i32
    return %arg0, %c0_i32 : i32, i32
  }
}

</mosaic_0001>

<bundles_post_ra>
// kernel: tpu_custom_call.1
= control target key start
LH: loop header
LB: loop body
LE: loop exit
PB: predicated region body
PF: predicated region fallthrough
CT: control target
= control target key end

     0   :  { %12 = vsyncpa [#allocation3], 0  ;;  %s513_s0 = inlined_call_operand.vmem [shape: f32[8,1], index: 0, kind: input, shape index: {}]   ;;  %s514_s1 = inlined_call_operand.vmem [shape: f32[1,32], index: 1, kind: input, shape index: {}]   ;;  %s515_s2 = inlined_call_operand.vmem [shape: f32[1,32], index: 2, kind: input, shape index: {}]   ;;  %s516_s3 = inlined_call_operand.hbm [shape: f32[32,32], index: 3, kind: input, shape index: {}]   ;;  %s517_s4 = inlined_call_operand.vmem [shape: f32[1,32], index: 4, kind: input, shape index: {}]   ;;  %s518_s5 = inlined_call_operand.hbm [shape: f32[32,256], index: 5, kind: input, shape index: {}]   ;;  %s519_s6 = inlined_call_operand.vmem [shape: f32[1,256], index: 6, kind: input, shape index: {}]   ;;  %s520_s7 = inlined_call_operand.hbm [shape: f32[8,128], index: 7, kind: output, shape index: {}]  }
   0x1   :  { %13 = vsyncpa [#allocation6], 0 }
   0x2   :  { %14 = vsyncpa [#allocation4], 0  ;;  %s409_s24 = smov [#allocation2]   ;;  %s337_s28 = scalar_lea.hbm %s516_s3, 512 }
   0x3   :  { %s26_s25 = sshll.u32 %s409_s24, 4  ;;  %p338_p0 = scmp.ne.s32.totalorder %s516_s3, %s337_s28  ;;  %s27_s25 = int_to_ptr.vmem [resolvable:$true] %s26_s25 }
   0x4   :  { %p341_p1 = scmp.lt.u32.totalorder %s337_s28, %s516_s3 }
   0x6   :  { %p343_p2 = pnand %p341_p1, %p338_p0 }
   0x8   :  { %346 = shalt.err (!%p343_p2)
}
   0x9   :  { %s347_s10 = scalar_lea.vmem %s27_s25, 512  ;;  %p352_p4 = scmp.lt.s32.totalorder %s27_s25, %s27_s25 }
   0xa   :  { %p348_p3 = scmp.ne.s32.totalorder %s27_s25, %s347_s10  ;;  %p353_p5 = scmp.lt.s32.totalorder %s347_s10, %s347_s10 }
   0xc   :  { %p354_p6 = por %p353_p5, %p352_p4 }
   0xe   :  { %p355_p7 = pnand %p354_p6, %p348_p3 }
  0x10   :  { %358 = shalt.err (!%p355_p7)
}
  0x11   :  { %s410_s11 = smov 128   ;;  %s411_s12 = smov 8  }
  0x12   :  { %32 = dma.hbm_to_vmem [thread:$0]  %s516_s3, 512, %s27_s25, [#allocation3], %s410_s11, %s410_s11, %s411_s12  }
  0x13   :  { %s412_s15 = smov [#allocation5]   ;;  %s359_s19 = scalar_lea.hbm %s518_s5, 1024 }
  0x14   :  { %s40_s16 = sshll.u32 %s412_s15, 4  ;;  %p360_p8 = scmp.ne.s32.totalorder %s518_s5, %s359_s19  ;;  %s41_s16 = int_to_ptr.vmem [resolvable:$true] %s40_s16 }
  0x15   :  { %p363_p9 = scmp.lt.u32.totalorder %s359_s19, %s518_s5 }
  0x17   :  { %p365_p10 = pnand %p363_p9, %p360_p8 }
  0x19   :  { %368 = shalt.err (!%p365_p10)
}
  0x1a   :  { %s369_s24 = scalar_lea.vmem %s41_s16, 1024  ;;  %p374_p12 = scmp.lt.s32.totalorder %s41_s16, %s41_s16 }
  0x1b   :  { %p370_p11 = scmp.ne.s32.totalorder %s41_s16, %s369_s24  ;;  %p375_p13 = scmp.lt.s32.totalorder %s369_s24, %s369_s24 }
  0x1d   :  { %p376_p0 = por %p375_p13, %p374_p12 }
  0x1f   :  { %p377_p1 = pnand %p376_p0, %p370_p11 }
  0x21   :  { %380 = shalt.err (!%p377_p1)
}
  0x22   :  { %s413_s3 = smov 256   ;;  %s414_s25 = smov 16  }
  0x23   :  { %46 = dma.hbm_to_vmem [thread:$0]  %s518_s5, 1024, %s41_s16, [#allocation6], %s413_s3, %s413_s3, %s414_s25  }
  0x24   :  { %403 = dma.done.wait [#allocation3], 512  }
  0x25   :  { %404 = vsyncadd [#allocation3], 4294966784 }
  0x26   :  { %405 = dma.done.wait [#allocation6], 1024  }
  0x27   :  { %406 = vsyncadd [#allocation6], 4294966272  ;;  %v415_v0 = vmov 0   ;;  %v55_v1 = vld [vmem:[%s513_s0] sm:$0xff]  ;;  %v79_v3 = vld [vmem:[#allocation2 + $0x8] sm:$0xff]  ;;  %v416_v5 = vmov 0.0|0.0   ;;  %v174_v33 = vlaneseq }
  0x28   :  { %328 = vset.pattern.permute.xlu0 %v415_v0  ;;  %v78_v2 = vld [vmem:[#allocation2] sm:$0xff]  ;;  %v80_v4 = vld [vmem:[#allocation2 + $0x10] sm:$0xff]  ;;  %303 = vmatprep.subr.bf16.mxu0 %v416_v5  ;;  %v81_v7 = vld [vmem:[#allocation2 + $0x18] sm:$0xff]  ;;  %vm417_vm0 = vmmov 0   ;;  %v418_v8 = vmov 0.0   ;;  %vm89_vm1 = vcmask 261120  }
  0x29   :  { %59 = vperm.xlu0 %328, %v55_v1   ;;  %v304_v6 = vpack.c.bf16 %v79_v3, %v78_v2  ;;  %300 = vmatprep.mubr.msk.f32.mxu0 %vm417_vm0, %v418_v8  ;;  %v307_v9 = vpack.c.bf16 %v81_v7, %v80_v4  ;;  %v282_v10 = vld [vmem:[%s514_s1] ss:$0 sm:$0xff]  ;;  %v165_v16 = vld [vmem:[#allocation5 + $0x8] sm:$0xff]  ;;  %v167_v17 = vld [vmem:[#allocation5 + $0x18] sm:$0xff]  ;;  %v175_v34 = vshrl.u32 %v174_v33, 7 }
  0x2a   :  { %251 = vmatprep.mubr.f32.mxu1 %v418_v8  ;;  %v283_v11 = vld [vmem:[%s515_s2] ss:$0 sm:$0xff]  ;;  %v309_v19 = vpack.c.bf16 %v167_v17, %v165_v16  ;;  %v166_v20 = vld [vmem:[#allocation5 + $0x10] sm:$0xff]  ;;  %v169_v21 = vld [vmem:[#allocation5 + $0x28] sm:$0xff] }
  0x2b   :  { %305 = vmatpush3.bf16.msra.mxu0 %v304_v6  ;;  %v164_v18 = vld [vmem:[#allocation5] sm:$0xff]  ;;  %v171_v22 = vld [vmem:[#allocation5 + $0x38] sm:$0xff]  ;;  %v170_v26 = vld [vmem:[#allocation5 + $0x30] sm:$0xff]  ;;  %v180_v35 = vsub.s32 1, %v175_v34  ;;  %v176_v45 = vsub.s32 0, %v175_v34 }
  0x2c   :  { %306 = vmatprep.subr.bf16.mxu0 %v416_v5  ;;  %v311_v23 = vpack.c.bf16 %v166_v20, %v164_v18  ;;  %v313_v24 = vpack.c.bf16 %v171_v22, %v169_v21  ;;  %v168_v25 = vld [vmem:[#allocation5 + $0x20] sm:$0xff]  ;;  %310 = vmatprep.subr.bf16.mxu1 %v309_v19 }
  0x2d   :  { %v315_v27 = vpack.c.bf16 %v170_v26, %v168_v25  ;;  %v284_v28 = vld [vmem:[%s517_s4] ss:$0 sm:$0xff]  ;;  %s419_s4 = smov [#allocation7]  }
  0x2e   :  { %312 = vmatpush1.bf16.msra.mxu1 %v311_v23  ;;  %v172_v36 = vld [vmem:[%s519_s6] sm:$0x3]  ;;  %s272_s11 = sshll.u32 %s419_s4, 4  ;;  %s273_s11 = int_to_ptr.vmem [resolvable:$true] %s272_s11 }
  0x2f   :  { %308 = vmatpush3.bf16.msra.mxu0 %v307_v9  ;;  %314 = vmatprep.subr.bf16.mxu1 %v313_v24  ;;  %v181_v37 = vrot.slane %v172_v36, %v180_v35  ;;  %v177_v46 = vrot.slane %v172_v36, %v176_v45  ;;  %s381_s6 = scalar_lea.vmem %s273_s11, 128  ;;  %p386_p3 = scmp.lt.s32.totalorder %s273_s11, %s273_s11 }
  0x30   :  { %p382_p2 = scmp.ne.s32.totalorder %s273_s11, %s381_s6  ;;  %p387_p4 = scmp.lt.s32.totalorder %s381_s6, %s381_s6 }
  0x32   :  { %316 = vmatpush1.bf16.msra.mxu1 %v315_v27  ;;  %p388_p5 = por %p387_p4, %p386_p3 }
  0x34   :  { %p389_p6 = pnand %p388_p5, %p382_p2 }
  0xa8   :  { %v60_v12 = vpop.permute.xlu0 %59 }
  0xa9   :  { %v68_v13 = vmul.f32 %v282_v10, %v60_v12 }
  0xab   :  { %v76_v14 = vadd.f32 %v283_v11, %v68_v13 }
  0xad   :  { %329 = vtanh.f32 %v76_v14 }
  0xb7   :  { %v330_v15 = vpop.eup %329 }
  0xb8   :  { %301 = vmatmul.mubr.msk.f32.vlgmr.msra.gmra.mrb[0].mxu0 %vm89_vm1, %v330_v15 }
 0x18b   :  { %v159_v29 = vpop.f32.mrb[0].mxu0 }
 0x18c   :  { %v160_v30 = vadd.f32 %v284_v28, %v159_v29  ;;  %v302_v31 = vpop.f32.mrb[1].mxu0 }
 0x18e   :  { %331 = vtanh.f32 %v160_v30 }
 0x198   :  { %v332_v32 = vpop.eup %331 }
 0x199   :  { %286 = vmatmul.mubr.msk.f32.vlgmr.msra.gmra.mrb[0].mxu1 %vm89_vm1, %v332_v32 }
 0x26c   :  { %v253_v38 = vpop.f32.mrb[0].mxu1 }
 0x26d   :  { %v255_v39 = vpop.f32.mrb[1].mxu1  ;;  %v254_v47 = vadd.f32 %v253_v38, %v177_v46 }
 0x26e   :  { %v256_v40 = vadd.f32 %v255_v39, %v181_v37 }
 0x270   :  { %v258_v41 = vsub.f32 0.0, %v256_v40 }
 0x272   :  { %v259_v42 = vmul.f32 1.442695, %v258_v41 }
 0x274   :  { %333 = vpow2.f32 %v259_v42 }
 0x27e   :  { %v334_v43 = vpop.eup %333 }
 0x27f   :  { %v261_v44 = vadd.f32 1.0, %v334_v43 }
 0x281   :  { %335 = vrcp.f32 %v261_v44 }
 0x28b   :  { %v336_v48 = vpop.eup %335 }
 0x28c   :  { %v264_v49 = vmul.f32 %v336_v48, %v254_v47 }
 0x28e   :  { %265 = vst [vmem:[#allocation7] sm:$0xff] %v264_v49 }
 0x28f   :  { %392 = shalt.err (!%p389_p6)
}
 0x290   :  { %s393_s14 = scalar_lea.hbm %s520_s7, 128 }
 0x291   :  { %p394_p7 = scmp.ne.s32.totalorder %s520_s7, %s393_s14  ;;  %p397_p8 = scmp.lt.u32.totalorder %s393_s14, %s520_s7 }
 0x293   :  { %p399_p9 = pnand %p397_p8, %p394_p7 }
 0x295   :  { %402 = shalt.err (!%p399_p9)
}
 0x296   :  { %275 = dma.vmem_to_hbm [thread:$0]  %s273_s11, 128, %s520_s7, [#allocation4]  }
 0x297   :  { %407 = dma.done.wait [#allocation4], 128  }
 0x298   :  { %408 = vsyncadd [#allocation4], 4294967168 }
 0x299   :  { %279 = vsyncpa [#allocation3], 1 }
 0x29a   :  { %280 = vsyncpa [#allocation6], 1 }
 0x29b   :  { %281 = vsyncpa [#allocation4], 1 }

</bundles_post_ra>
